<compile_context>
chip_gen: v5e
topology: v5e:2x2
jax: 0.10.0
libtpu: 0.0.40
codegen_flags: <defaults>
</compile_context>

<pallas_src>
import functools

import jax
import jax.numpy as jnp
from jax import lax
from jax.experimental import pallas as pl
from jax.experimental.pallas import tpu as pltpu


def _signed32(x):
    x &= 0xFFFFFFFF
    return x - (1 << 32) if x >= (1 << 31) else x


_GOLD = _signed32(0x9E3779B9)   # golden-ratio Weyl constant
_MIX1 = _signed32(0x85EBCA6B)   # murmur3 fmix32 constants
_MIX2 = _signed32(0xC2B2AE35)


def _srl(x, nbits):
    """Logical (bit-pattern) right shift on int32 values."""
    return lax.shift_right_logical(x, jnp.full(x.shape, nbits, x.dtype))


def _fmix32(x):
    """murmur3 32-bit finalizer: bijective avalanche mixer on int32."""
    x = x ^ _srl(x, 16)
    x = x * _MIX1
    x = x ^ _srl(x, 13)
    x = x * _MIX2
    x = x ^ _srl(x, 16)
    return x


def _img2spike_kernel(seed_ref, img_ref, spk_ref, cnt_ref, *,
                      scale, t_blk, negative_spikes):
    tile = pl.program_id(0)          # spatial (row) tile index
    tb = pl.program_id(1)            # time-block index
    seed = seed_ref[0]

    row_blk, cols = img_ref.shape
    img = img_ref[...].astype(jnp.float32)

    # Firing probability -> integer threshold in [0, 2^24], computed once per
    # T_BLK timesteps.  Zero-padded elements get threshold 0 -> never fire.
    if negative_spikes:
        probs = jnp.abs(img) * jnp.float32(scale)
    else:
        probs = img * jnp.float32(scale)
    probs = jnp.clip(probs, 0.0, 1.0)
    thresh = (probs * jnp.float32(1 << 24)).astype(jnp.int32)
    if negative_spikes:
        sgn = jnp.sign(img)

    # Global spatial index of every element of this tile (for the hash).
    r_iota = lax.broadcasted_iota(jnp.int32, (row_blk, cols), 0)
    c_iota = lax.broadcasted_iota(jnp.int32, (row_blk, cols), 1)
    pos = (tile * row_blk + r_iota) * cols + c_iota

    total = jnp.float32(0.0)
    for lt in range(t_blk):                       # static, small (<= 8)
        t = tb * t_blk + lt
        tkey = _fmix32(seed * _MIX2 + t * _GOLD)  # per-(seed, t) scalar key
        bits = _fmix32(pos * _GOLD + tkey)        # 32 mixed bits per element
        r24 = _srl(bits, 8)                       # uniform int in [0, 2^24)
        fired = r24 < thresh
        if negative_spikes:
            spk = jnp.where(fired, sgn, jnp.float32(0.0))
        else:
            spk = fired.astype(jnp.float32)
        spk_ref[lt, :, :] = spk.astype(spk_ref.dtype)
        total = total + jnp.sum(fired.astype(jnp.float32))

    cnt_ref[...] = jnp.broadcast_to(total, (1, 1, 1, 1))


def _round_up(x, m):
    return ((x + m - 1) // m) * m


def _choose_slab(n):
    """Pick a lane-dense (rows, cols) layout with cols a multiple of 128."""
    # Prefer factorizations with full (8,128) tiles and no padding at all.
    for cols in (2048, 1024, 512, 256, 128):
        if n % cols == 0 and (n // cols) % 8 == 0:
            return n // cols, cols
    # Next best: lane-dense, arbitrary row count (covered by a full-row block).
    for cols in (2048, 1024, 512, 256, 128):
        if n % cols == 0:
            return n // cols, cols
    # Fall back to padding the flattened image up to a multiple of 128 lanes.
    cols = 128
    return -(-n // cols), cols


def _pick_t_block(tw, cap=8):
    for d in range(min(tw, cap), 0, -1):
        if tw % d == 0:
            return d
    return 1


def img2spike(img_input, *, tw=100, max_rate=1000.0, norm=255.0,
              squeeze=False, negative_spikes=False, seed=0,
              out_dtype=jnp.bfloat16):
    """JAX/Pallas equivalent of Img2SpikeLayer.forward.

    Returns (spk_img, spikes_number); spk_img has shape (tw, *img_input.shape)
    after the optional squeeze.  Spike values are exactly {-1, 0, 1}, so the
    bfloat16 default is lossless; use out_dtype=jnp.float32 for dtype parity.
    """
    if squeeze:
        img_input = jnp.squeeze(img_input)
    orig_shape = tuple(img_input.shape)
    n = 1
    for d in orig_shape:
        n *= int(d)

    rows, cols = _choose_slab(n)
    # Row tile: aim for ~64K elements per tile, a multiple of 8 rows (fits
    # comfortably in VMEM on v5e/v6e and on v7x's 64 MiB).
    max_row_blk = max(8, (65536 // cols) // 8 * 8)
    if rows <= max_row_blk:
        row_blk = max(rows, 1)
        rows_pad = row_blk
    else:
        row_blk = max_row_blk
        rows_pad = _round_up(rows, row_blk)
    n_tiles = rows_pad // row_blk

    t_blk = _pick_t_block(tw)
    n_tb = tw // t_blk

    # Zero-pad the flattened image; padded pixels have firing prob 0 -> no
    # spikes, so they never contribute to spikes_number.
    flat = jnp.reshape(img_input, (-1,)).astype(jnp.float32)
    n_pad = rows_pad * cols
    if n_pad != n:
        flat = jnp.pad(flat, (0, n_pad - n))
    slab = flat.reshape(rows_pad, cols)

    seed_arr = jnp.asarray([seed], dtype=jnp.int32)
    scale = float(max_rate) / 1000.0 / float(norm)

    kernel = functools.partial(
        _img2spike_kernel,
        scale=scale, t_blk=t_blk, negative_spikes=bool(negative_spikes))

    spk_flat, counts = pl.pallas_call(
        kernel,
        out_shape=(
            jax.ShapeDtypeStruct((tw, rows_pad, cols), out_dtype),
            jax.ShapeDtypeStruct((n_tiles, n_tb, 1, 1), jnp.float32),
        ),
        grid_spec=pltpu.PrefetchScalarGridSpec(
            num_scalar_prefetch=1,
            grid=(n_tiles, n_tb),                 # time = inner (fast) axis
            in_specs=[
                # image tile stays resident across the whole time loop
                pl.BlockSpec((row_blk, cols), lambda i, j, s: (i, 0)),
            ],
            out_specs=[
                pl.BlockSpec((t_blk, row_blk, cols), lambda i, j, s: (j, i, 0)),
                pl.BlockSpec((1, 1, 1, 1), lambda i, j, s: (i, j, 0, 0)),
            ],
        ),
        compiler_params=pltpu.CompilerParams(
            # every (tile, time-block) is independent -> shardable on v7x megacore
            dimension_semantics=("parallel", "parallel"),
        ),
    )(seed_arr, slab)

    spk = spk_flat.reshape(tw, n_pad)
    if n_pad != n:
        spk = spk[:, :n]
    spk_img = spk.reshape((tw,) + orig_shape)
    spikes_number = jnp.sum(counts)     # fused in-kernel partial counts
    return spk_img, spikes_number


if __name__ == "__main__":
    key = jax.random.PRNGKey(0)
    B, C, H, W = 2, 4, 16, 16
    tw = 8
    # image-like input in [0, 255]
    img = jax.random.uniform(key, (B, C, H, W), dtype=jnp.float32) * 255.0

    spk_img, spikes_number = img2spike(
        img, tw=tw, max_rate=1000.0, norm=255.0,
        squeeze=False, negative_spikes=False, seed=0)
    jax.block_until_ready(spk_img)
    jax.block_until_ready(spikes_number)

    assert spk_img.shape == (tw, B, C, H, W)
    vals = spk_img.astype(jnp.float32)
    assert bool(jnp.all((vals == 0.0) | (vals == 1.0)))
    # fused in-kernel count must match a host-side reduction of the output
    assert float(spikes_number) == float(jnp.sum(jnp.abs(vals)))
    # empirical firing rate should track the requested probability
    mean_rate = float(jnp.mean(vals))
    expect = float(jnp.mean(img) / 255.0)
    assert abs(mean_rate - expect) < 0.05, (mean_rate, expect)

    # negative-spikes variant
    spk_neg, n_neg = img2spike(
        img - 127.5, tw=tw, max_rate=1000.0, norm=255.0,
        negative_spikes=True, seed=1)
    jax.block_until_ready(spk_neg)
    v = spk_neg.astype(jnp.float32)
    assert bool(jnp.all((v == -1.0) | (v == 0.0) | (v == 1.0)))
    assert float(n_neg) == float(jnp.sum(jnp.abs(v)))

    print("KERNEL_OK")
</pallas_src>

<mosaic_0001>
module attributes {stable_mosaic.version = 11 : i64} {
  func.func @_img2spike_kernel(%arg0: i32, %arg1: i32, %arg2: memref<1xi32, #tpu.memory_space<smem>>, %arg3: memref<8x256xf32, #tpu.memory_space<vmem>>, %arg4: memref<8x8x256xbf16, #tpu.memory_space<vmem>>, %arg5: memref<1x1x1x1xf32, #tpu.memory_space<vmem>>) attributes {dimension_semantics = [#tpu.dimension_semantics<parallel>, #tpu.dimension_semantics<parallel>], iteration_bounds = array<i64: 1, 1>, scalar_prefetch = 1 : i64, scratch_operands = 0 : i64, tpu.core_type = #tpu.core_type<tc>, window_params = [{transform_indices = @transform_0, window_bounds = array<i64: 8, 256>}, {transform_indices = @transform_1, window_bounds = array<i64: 8, 8, 256>}, {transform_indices = @transform_2, window_bounds = array<i64: 1, 1, 1, 1>}]} {
    %c0 = arith.constant 0 : index
    %0 = memref.load %arg2[%c0] : memref<1xi32, #tpu.memory_space<smem>>
    %c0_0 = arith.constant 0 : index
    %c0_1 = arith.constant 0 : index
    %1 = vector.load %arg3[%c0_0, %c0_1] : memref<8x256xf32, #tpu.memory_space<vmem>>, vector<8x256xf32>
    %cst = arith.constant 0.00392156886 : f32
    %2 = vector.broadcast %cst : f32 to vector<8x256xf32>
    %3 = arith.mulf %1, %2 : vector<8x256xf32>
    %cst_2 = arith.constant 0.000000e+00 : f32
    %cst_3 = arith.constant 1.000000e+00 : f32
    %4 = vector.broadcast %cst_2 : f32 to vector<8x256xf32>
    %5 = arith.maximumf %4, %3 : vector<8x256xf32>
    %6 = vector.broadcast %cst_3 : f32 to vector<8x256xf32>
    %7 = arith.minimumf %6, %5 : vector<8x256xf32>
    %cst_4 = arith.constant 0x4B800000 : f32
    %8 = vector.broadcast %cst_4 : f32 to vector<8x256xf32>
    %9 = arith.mulf %7, %8 : vector<8x256xf32>
    %10 = arith.fptosi %9 : vector<8x256xf32> to vector<8x256xi32>
    %11 = tpu.iota {dimensions = array<i32: 0>} : vector<8x256xi32>
    %12 = tpu.iota {dimensions = array<i32: 1>} : vector<8x256xi32>
    %c8_i32 = arith.constant 8 : i32
    %13 = arith.muli %arg0, %c8_i32 : i32
    %14 = vector.broadcast %13 : i32 to vector<8x256xi32>
    %15 = arith.addi %14, %11 : vector<8x256xi32>
    %c256_i32 = arith.constant 256 : i32
    %16 = vector.broadcast %c256_i32 : i32 to vector<8x256xi32>
    %17 = arith.muli %15, %16 : vector<8x256xi32>
    %18 = arith.addi %17, %12 : vector<8x256xi32>
    %c8_i32_5 = arith.constant 8 : i32
    %19 = arith.muli %arg1, %c8_i32_5 : i32
    %c0_i32 = arith.constant 0 : i32
    %20 = arith.addi %19, %c0_i32 : i32
    %c-1028477387_i32 = arith.constant -1028477387 : i32
    %21 = arith.muli %0, %c-1028477387_i32 : i32
    %c-1640531527_i32 = arith.constant -1640531527 : i32
    %22 = arith.muli %20, %c-1640531527_i32 : i32
    %23 = arith.addi %21, %22 : i32
    %c16_i32 = arith.constant 16 : i32
    %24 = arith.shrui %23, %c16_i32 : i32
    %25 = arith.xori %23, %24 : i32
    %c-2048144789_i32 = arith.constant -2048144789 : i32
    %26 = arith.muli %25, %c-2048144789_i32 : i32
    %c13_i32 = arith.constant 13 : i32
    %27 = arith.shrui %26, %c13_i32 : i32
    %28 = arith.xori %26, %27 : i32
    %c-1028477387_i32_6 = arith.constant -1028477387 : i32
    %29 = arith.muli %28, %c-1028477387_i32_6 : i32
    %c16_i32_7 = arith.constant 16 : i32
    %30 = arith.shrui %29, %c16_i32_7 : i32
    %31 = arith.xori %29, %30 : i32
    %c-1640531527_i32_8 = arith.constant -1640531527 : i32
    %32 = vector.broadcast %c-1640531527_i32_8 : i32 to vector<8x256xi32>
    %33 = arith.muli %18, %32 : vector<8x256xi32>
    %34 = vector.broadcast %31 : i32 to vector<8x256xi32>
    %35 = arith.addi %33, %34 : vector<8x256xi32>
    %c16_i32_9 = arith.constant 16 : i32
    %36 = vector.broadcast %c16_i32_9 : i32 to vector<8x256xi32>
    %37 = arith.shrui %35, %36 : vector<8x256xi32>
    %38 = arith.xori %35, %37 : vector<8x256xi32>
    %c-2048144789_i32_10 = arith.constant -2048144789 : i32
    %39 = vector.broadcast %c-2048144789_i32_10 : i32 to vector<8x256xi32>
    %40 = arith.muli %38, %39 : vector<8x256xi32>
    %c13_i32_11 = arith.constant 13 : i32
    %41 = vector.broadcast %c13_i32_11 : i32 to vector<8x256xi32>
    %42 = arith.shrui %40, %41 : vector<8x256xi32>
    %43 = arith.xori %40, %42 : vector<8x256xi32>
    %c-1028477387_i32_12 = arith.constant -1028477387 : i32
    %44 = vector.broadcast %c-1028477387_i32_12 : i32 to vector<8x256xi32>
    %45 = arith.muli %43, %44 : vector<8x256xi32>
    %c16_i32_13 = arith.constant 16 : i32
    %46 = vector.broadcast %c16_i32_13 : i32 to vector<8x256xi32>
    %47 = arith.shrui %45, %46 : vector<8x256xi32>
    %48 = arith.xori %45, %47 : vector<8x256xi32>
    %c8_i32_14 = arith.constant 8 : i32
    %49 = vector.broadcast %c8_i32_14 : i32 to vector<8x256xi32>
    %50 = arith.shrui %48, %49 : vector<8x256xi32>
    %51 = arith.cmpi slt, %50, %10 : vector<8x256xi32>
    %52 = arith.extui %51 : vector<8x256xi1> to vector<8x256xi32>
    %53 = arith.sitofp %52 : vector<8x256xi32> to vector<8x256xf32>
    %54 = arith.truncf %53 : vector<8x256xf32> to vector<8x256xbf16>
    %c0_15 = arith.constant 0 : index
    %c0_16 = arith.constant 0 : index
    %c0_17 = arith.constant 0 : index
    %55 = vector.load %arg4[%c0_15, %c0_16, %c0_17] : memref<8x8x256xbf16, #tpu.memory_space<vmem>>, vector<1x8x256xbf16>
    %56 = vector.shape_cast %55 : vector<1x8x256xbf16> to vector<8x256xbf16>
    %57 = vector.shape_cast %54 : vector<8x256xbf16> to vector<1x8x256xbf16>
    tpu.vector_store %arg4[%c0_15, %c0_16, %c0_17], %57 {strides = array<i32>} : memref<8x8x256xbf16, #tpu.memory_space<vmem>>, vector<1x8x256xbf16>,
    %58 = arith.extui %51 : vector<8x256xi1> to vector<8x256xi32>
    %59 = arith.sitofp %58 : vector<8x256xi32> to vector<8x256xf32>
    %60 = vector.shape_cast %59 : vector<8x256xf32> to vector<1x8x256xf32>
    %cst_18 = arith.constant dense<0.000000e+00> : vector<1xf32>
    %61 = vector.multi_reduction <add>, %60, %cst_18 [1, 2] : vector<1x8x256xf32> to vector<1xf32>
    %62 = vector.shape_cast %61 : vector<1xf32> to vector<1x1x1xf32>
    %63 = vector.extract %62[0, 0, 0] : f32 from vector<1x1x1xf32>
    %cst_19 = arith.constant 0.000000e+00 : f32
    %64 = arith.addf %cst_19, %63 : f32
    %c8_i32_20 = arith.constant 8 : i32
    %65 = arith.muli %arg1, %c8_i32_20 : i32
    %c1_i32 = arith.constant 1 : i32
    %66 = arith.addi %65, %c1_i32 : i32
    %c-1028477387_i32_21 = arith.constant -1028477387 : i32
    %67 = arith.muli %0, %c-1028477387_i32_21 : i32
    %c-1640531527_i32_22 = arith.constant -1640531527 : i32
    %68 = arith.muli %66, %c-1640531527_i32_22 : i32
    %69 = arith.addi %67, %68 : i32
    %c16_i32_23 = arith.constant 16 : i32
    %70 = arith.shrui %69, %c16_i32_23 : i32
    %71 = arith.xori %69, %70 : i32
    %c-2048144789_i32_24 = arith.constant -2048144789 : i32
    %72 = arith.muli %71, %c-2048144789_i32_24 : i32
    %c13_i32_25 = arith.constant 13 : i32
    %73 = arith.shrui %72, %c13_i32_25 : i32
    %74 = arith.xori %72, %73 : i32
    %c-1028477387_i32_26 = arith.constant -1028477387 : i32
    %75 = arith.muli %74, %c-1028477387_i32_26 : i32
    %c16_i32_27 = arith.constant 16 : i32
    %76 = arith.shrui %75, %c16_i32_27 : i32
    %77 = arith.xori %75, %76 : i32
    %c-1640531527_i32_28 = arith.constant -1640531527 : i32
    %78 = vector.broadcast %c-1640531527_i32_28 : i32 to vector<8x256xi32>
    %79 = arith.muli %18, %78 : vector<8x256xi32>
    %80 = vector.broadcast %77 : i32 to vector<8x256xi32>
    %81 = arith.addi %79, %80 : vector<8x256xi32>
    %c16_i32_29 = arith.constant 16 : i32
    %82 = vector.broadcast %c16_i32_29 : i32 to vector<8x256xi32>
    %83 = arith.shrui %81, %82 : vector<8x256xi32>
    %84 = arith.xori %81, %83 : vector<8x256xi32>
    %c-2048144789_i32_30 = arith.constant -2048144789 : i32
    %85 = vector.broadcast %c-2048144789_i32_30 : i32 to vector<8x256xi32>
    %86 = arith.muli %84, %85 : vector<8x256xi32>
    %c13_i32_31 = arith.constant 13 : i32
    %87 = vector.broadcast %c13_i32_31 : i32 to vector<8x256xi32>
    %88 = arith.shrui %86, %87 : vector<8x256xi32>
    %89 = arith.xori %86, %88 : vector<8x256xi32>
    %c-1028477387_i32_32 = arith.constant -1028477387 : i32
    %90 = vector.broadcast %c-1028477387_i32_32 : i32 to vector<8x256xi32>
    %91 = arith.muli %89, %90 : vector<8x256xi32>
    %c16_i32_33 = arith.constant 16 : i32
    %92 = vector.broadcast %c16_i32_33 : i32 to vector<8x256xi32>
    %93 = arith.shrui %91, %92 : vector<8x256xi32>
    %94 = arith.xori %91, %93 : vector<8x256xi32>
    %c8_i32_34 = arith.constant 8 : i32
    %95 = vector.broadcast %c8_i32_34 : i32 to vector<8x256xi32>
    %96 = arith.shrui %94, %95 : vector<8x256xi32>
    %97 = arith.cmpi slt, %96, %10 : vector<8x256xi32>
    %98 = arith.extui %97 : vector<8x256xi1> to vector<8x256xi32>
    %99 = arith.sitofp %98 : vector<8x256xi32> to vector<8x256xf32>
    %100 = arith.truncf %99 : vector<8x256xf32> to vector<8x256xbf16>
    %c1 = arith.constant 1 : index
    %c0_35 = arith.constant 0 : index
    %c0_36 = arith.constant 0 : index
    %101 = vector.load %arg4[%c1, %c0_35, %c0_36] : memref<8x8x256xbf16, #tpu.memory_space<vmem>>, vector<1x8x256xbf16>
    %102 = vector.shape_cast %101 : vector<1x8x256xbf16> to vector<8x256xbf16>
    %103 = vector.shape_cast %100 : vector<8x256xbf16> to vector<1x8x256xbf16>
    tpu.vector_store %arg4[%c1, %c0_35, %c0_36], %103 {strides = array<i32>} : memref<8x8x256xbf16, #tpu.memory_space<vmem>>, vector<1x8x256xbf16>,
    %104 = arith.extui %97 : vector<8x256xi1> to vector<8x256xi32>
    %105 = arith.sitofp %104 : vector<8x256xi32> to vector<8x256xf32>
    %106 = vector.shape_cast %105 : vector<8x256xf32> to vector<1x8x256xf32>
    %cst_37 = arith.constant dense<0.000000e+00> : vector<1xf32>
    %107 = vector.multi_reduction <add>, %106, %cst_37 [1, 2] : vector<1x8x256xf32> to vector<1xf32>
    %108 = vector.shape_cast %107 : vector<1xf32> to vector<1x1x1xf32>
    %109 = vector.extract %108[0, 0, 0] : f32 from vector<1x1x1xf32>
    %110 = arith.addf %64, %109 : f32
    %c8_i32_38 = arith.constant 8 : i32
    %111 = arith.muli %arg1, %c8_i32_38 : i32
    %c2_i32 = arith.constant 2 : i32
    %112 = arith.addi %111, %c2_i32 : i32
    %c-1028477387_i32_39 = arith.constant -1028477387 : i32
    %113 = arith.muli %0, %c-1028477387_i32_39 : i32
    %c-1640531527_i32_40 = arith.constant -1640531527 : i32
    %114 = arith.muli %112, %c-1640531527_i32_40 : i32
    %115 = arith.addi %113, %114 : i32
    %c16_i32_41 = arith.constant 16 : i32
    %116 = arith.shrui %115, %c16_i32_41 : i32
    %117 = arith.xori %115, %116 : i32
    %c-2048144789_i32_42 = arith.constant -2048144789 : i32
    %118 = arith.muli %117, %c-2048144789_i32_42 : i32
    %c13_i32_43 = arith.constant 13 : i32
    %119 = arith.shrui %118, %c13_i32_43 : i32
    %120 = arith.xori %118, %119 : i32
    %c-1028477387_i32_44 = arith.constant -1028477387 : i32
    %121 = arith.muli %120, %c-1028477387_i32_44 : i32
    %c16_i32_45 = arith.constant 16 : i32
    %122 = arith.shrui %121, %c16_i32_45 : i32
    %123 = arith.xori %121, %122 : i32
    %c-1640531527_i32_46 = arith.constant -1640531527 : i32
    %124 = vector.broadcast %c-1640531527_i32_46 : i32 to vector<8x256xi32>
    %125 = arith.muli %18, %124 : vector<8x256xi32>
    %126 = vector.broadcast %123 : i32 to vector<8x256xi32>
    %127 = arith.addi %125, %126 : vector<8x256xi32>
    %c16_i32_47 = arith.constant 16 : i32
    %128 = vector.broadcast %c16_i32_47 : i32 to vector<8x256xi32>
    %129 = arith.shrui %127, %128 : vector<8x256xi32>
    %130 = arith.xori %127, %129 : vector<8x256xi32>
    %c-2048144789_i32_48 = arith.constant -2048144789 : i32
    %131 = vector.broadcast %c-2048144789_i32_48 : i32 to vector<8x256xi32>
    %132 = arith.muli %130, %131 : vector<8x256xi32>
    %c13_i32_49 = arith.constant 13 : i32
    %133 = vector.broadcast %c13_i32_49 : i32 to vector<8x256xi32>
    %134 = arith.shrui %132, %133 : vector<8x256xi32>
    %135 = arith.xori %132, %134 : vector<8x256xi32>
    %c-1028477387_i32_50 = arith.constant -1028477387 : i32
    %136 = vector.broadcast %c-1028477387_i32_50 : i32 to vector<8x256xi32>
    %137 = arith.muli %135, %136 : vector<8x256xi32>
    %c16_i32_51 = arith.constant 16 : i32
    %138 = vector.broadcast %c16_i32_51 : i32 to vector<8x256xi32>
    %139 = arith.shrui %137, %138 : vector<8x256xi32>
    %140 = arith.xori %137, %139 : vector<8x256xi32>
    %c8_i32_52 = arith.constant 8 : i32
    %141 = vector.broadcast %c8_i32_52 : i32 to vector<8x256xi32>
    %142 = arith.shrui %140, %141 : vector<8x256xi32>
    %143 = arith.cmpi slt, %142, %10 : vector<8x256xi32>
    %144 = arith.extui %143 : vector<8x256xi1> to vector<8x256xi32>
    %145 = arith.sitofp %144 : vector<8x256xi32> to vector<8x256xf32>
    %146 = arith.truncf %145 : vector<8x256xf32> to vector<8x256xbf16>
    %c2 = arith.constant 2 : index
    %c0_53 = arith.constant 0 : index
    %c0_54 = arith.constant 0 : index
    %147 = vector.load %arg4[%c2, %c0_53, %c0_54] : memref<8x8x256xbf16, #tpu.memory_space<vmem>>, vector<1x8x256xbf16>
    %148 = vector.shape_cast %147 : vector<1x8x256xbf16> to vector<8x256xbf16>
    %149 = vector.shape_cast %146 : vector<8x256xbf16> to vector<1x8x256xbf16>
    tpu.vector_store %arg4[%c2, %c0_53, %c0_54], %149 {strides = array<i32>} : memref<8x8x256xbf16, #tpu.memory_space<vmem>>, vector<1x8x256xbf16>,
    %150 = arith.extui %143 : vector<8x256xi1> to vector<8x256xi32>
    %151 = arith.sitofp %150 : vector<8x256xi32> to vector<8x256xf32>
    %152 = vector.shape_cast %151 : vector<8x256xf32> to vector<1x8x256xf32>
    %cst_55 = arith.constant dense<0.000000e+00> : vector<1xf32>
    %153 = vector.multi_reduction <add>, %152, %cst_55 [1, 2] : vector<1x8x256xf32> to vector<1xf32>
    %154 = vector.shape_cast %153 : vector<1xf32> to vector<1x1x1xf32>
    %155 = vector.extract %154[0, 0, 0] : f32 from vector<1x1x1xf32>
    %156 = arith.addf %110, %155 : f32
    %c8_i32_56 = arith.constant 8 : i32
    %157 = arith.muli %arg1, %c8_i32_56 : i32
    %c3_i32 = arith.constant 3 : i32
    %158 = arith.addi %157, %c3_i32 : i32
    %c-1028477387_i32_57 = arith.constant -1028477387 : i32
    %159 = arith.muli %0, %c-1028477387_i32_57 : i32
    %c-1640531527_i32_58 = arith.constant -1640531527 : i32
    %160 = arith.muli %158, %c-1640531527_i32_58 : i32
    %161 = arith.addi %159, %160 : i32
    %c16_i32_59 = arith.constant 16 : i32
    %162 = arith.shrui %161, %c16_i32_59 : i32
    %163 = arith.xori %161, %162 : i32
    %c-2048144789_i32_60 = arith.constant -2048144789 : i32
    %164 = arith.muli %163, %c-2048144789_i32_60 : i32
    %c13_i32_61 = arith.constant 13 : i32
    %165 = arith.shrui %164, %c13_i32_61 : i32
    %166 = arith.xori %164, %165 : i32
    %c-1028477387_i32_62 = arith.constant -1028477387 : i32
    %167 = arith.muli %166, %c-1028477387_i32_62 : i32
    %c16_i32_63 = arith.constant 16 : i32
    %168 = arith.shrui %167, %c16_i32_63 : i32
    %169 = arith.xori %167, %168 : i32
    %c-1640531527_i32_64 = arith.constant -1640531527 : i32
    %170 = vector.broadcast %c-1640531527_i32_64 : i32 to vector<8x256xi32>
    %171 = arith.muli %18, %170 : vector<8x256xi32>
    %172 = vector.broadcast %169 : i32 to vector<8x256xi32>
    %173 = arith.addi %171, %172 : vector<8x256xi32>
    %c16_i32_65 = arith.constant 16 : i32
    %174 = vector.broadcast %c16_i32_65 : i32 to vector<8x256xi32>
    %175 = arith.shrui %173, %174 : vector<8x256xi32>
    %176 = arith.xori %173, %175 : vector<8x256xi32>
    %c-2048144789_i32_66 = arith.constant -2048144789 : i32
    %177 = vector.broadcast %c-2048144789_i32_66 : i32 to vector<8x256xi32>
    %178 = arith.muli %176, %177 : vector<8x256xi32>
    %c13_i32_67 = arith.constant 13 : i32
    %179 = vector.broadcast %c13_i32_67 : i32 to vector<8x256xi32>
    %180 = arith.shrui %178, %179 : vector<8x256xi32>
    %181 = arith.xori %178, %180 : vector<8x256xi32>
    %c-1028477387_i32_68 = arith.constant -1028477387 : i32
    %182 = vector.broadcast %c-1028477387_i32_68 : i32 to vector<8x256xi32>
    %183 = arith.muli %181, %182 : vector<8x256xi32>
    %c16_i32_69 = arith.constant 16 : i32
    %184 = vector.broadcast %c16_i32_69 : i32 to vector<8x256xi32>
    %185 = arith.shrui %183, %184 : vector<8x256xi32>
    %186 = arith.xori %183, %185 : vector<8x256xi32>
    %c8_i32_70 = arith.constant 8 : i32
    %187 = vector.broadcast %c8_i32_70 : i32 to vector<8x256xi32>
    %188 = arith.shrui %186, %187 : vector<8x256xi32>
    %189 = arith.cmpi slt, %188, %10 : vector<8x256xi32>
    %190 = arith.extui %189 : vector<8x256xi1> to vector<8x256xi32>
    %191 = arith.sitofp %190 : vector<8x256xi32> to vector<8x256xf32>
    %192 = arith.truncf %191 : vector<8x256xf32> to vector<8x256xbf16>
    %c3 = arith.constant 3 : index
    %c0_71 = arith.constant 0 : index
    %c0_72 = arith.constant 0 : index
    %193 = vector.load %arg4[%c3, %c0_71, %c0_72] : memref<8x8x256xbf16, #tpu.memory_space<vmem>>, vector<1x8x256xbf16>
    %194 = vector.shape_cast %193 : vector<1x8x256xbf16> to vector<8x256xbf16>
    %195 = vector.shape_cast %192 : vector<8x256xbf16> to vector<1x8x256xbf16>
    tpu.vector_store %arg4[%c3, %c0_71, %c0_72], %195 {strides = array<i32>} : memref<8x8x256xbf16, #tpu.memory_space<vmem>>, vector<1x8x256xbf16>,
    %196 = arith.extui %189 : vector<8x256xi1> to vector<8x256xi32>
    %197 = arith.sitofp %196 : vector<8x256xi32> to vector<8x256xf32>
    %198 = vector.shape_cast %197 : vector<8x256xf32> to vector<1x8x256xf32>
    %cst_73 = arith.constant dense<0.000000e+00> : vector<1xf32>
    %199 = vector.multi_reduction <add>, %198, %cst_73 [1, 2] : vector<1x8x256xf32> to vector<1xf32>
    %200 = vector.shape_cast %199 : vector<1xf32> to vector<1x1x1xf32>
    %201 = vector.extract %200[0, 0, 0] : f32 from vector<1x1x1xf32>
    %202 = arith.addf %156, %201 : f32
    %c8_i32_74 = arith.constant 8 : i32
    %203 = arith.muli %arg1, %c8_i32_74 : i32
    %c4_i32 = arith.constant 4 : i32
    %204 = arith.addi %203, %c4_i32 : i32
    %c-1028477387_i32_75 = arith.constant -1028477387 : i32
    %205 = arith.muli %0, %c-1028477387_i32_75 : i32
    %c-1640531527_i32_76 = arith.constant -1640531527 : i32
    %206 = arith.muli %204, %c-1640531527_i32_76 : i32
    %207 = arith.addi %205, %206 : i32
    %c16_i32_77 = arith.constant 16 : i32
    %208 = arith.shrui %207, %c16_i32_77 : i32
    %209 = arith.xori %207, %208 : i32
    %c-2048144789_i32_78 = arith.constant -2048144789 : i32
    %210 = arith.muli %209, %c-2048144789_i32_78 : i32
    %c13_i32_79 = arith.constant 13 : i32
    %211 = arith.shrui %210, %c13_i32_79 : i32
    %212 = arith.xori %210, %211 : i32
    %c-1028477387_i32_80 = arith.constant -1028477387 : i32
    %213 = arith.muli %212, %c-1028477387_i32_80 : i32
    %c16_i32_81 = arith.constant 16 : i32
    %214 = arith.shrui %213, %c16_i32_81 : i32
    %215 = arith.xori %213, %214 : i32
    %c-1640531527_i32_82 = arith.constant -1640531527 : i32
    %216 = vector.broadcast %c-1640531527_i32_82 : i32 to vector<8x256xi32>
    %217 = arith.muli %18, %216 : vector<8x256xi32>
    %218 = vector.broadcast %215 : i32 to vector<8x256xi32>
    %219 = arith.addi %217, %218 : vector<8x256xi32>
    %c16_i32_83 = arith.constant 16 : i32
    %220 = vector.broadcast %c16_i32_83 : i32 to vector<8x256xi32>
    %221 = arith.shrui %219, %220 : vector<8x256xi32>
    %222 = arith.xori %219, %221 : vector<8x256xi32>
    %c-2048144789_i32_84 = arith.constant -2048144789 : i32
    %223 = vector.broadcast %c-2048144789_i32_84 : i32 to vector<8x256xi32>
    %224 = arith.muli %222, %223 : vector<8x256xi32>
    %c13_i32_85 = arith.constant 13 : i32
    %225 = vector.broadcast %c13_i32_85 : i32 to vector<8x256xi32>
    %226 = arith.shrui %224, %225 : vector<8x256xi32>
    %227 = arith.xori %224, %226 : vector<8x256xi32>
    %c-1028477387_i32_86 = arith.constant -1028477387 : i32
    %228 = vector.broadcast %c-1028477387_i32_86 : i32 to vector<8x256xi32>
    %229 = arith.muli %227, %228 : vector<8x256xi32>
    %c16_i32_87 = arith.constant 16 : i32
    %230 = vector.broadcast %c16_i32_87 : i32 to vector<8x256xi32>
    %231 = arith.shrui %229, %230 : vector<8x256xi32>
    %232 = arith.xori %229, %231 : vector<8x256xi32>
    %c8_i32_88 = arith.constant 8 : i32
    %233 = vector.broadcast %c8_i32_88 : i32 to vector<8x256xi32>
    %234 = arith.shrui %232, %233 : vector<8x256xi32>
    %235 = arith.cmpi slt, %234, %10 : vector<8x256xi32>
    %236 = arith.extui %235 : vector<8x256xi1> to vector<8x256xi32>
    %237 = arith.sitofp %236 : vector<8x256xi32> to vector<8x256xf32>
    %238 = arith.truncf %237 : vector<8x256xf32> to vector<8x256xbf16>
    %c4 = arith.constant 4 : index
    %c0_89 = arith.constant 0 : index
    %c0_90 = arith.constant 0 : index
    %239 = vector.load %arg4[%c4, %c0_89, %c0_90] : memref<8x8x256xbf16, #tpu.memory_space<vmem>>, vector<1x8x256xbf16>
    %240 = vector.shape_cast %239 : vector<1x8x256xbf16> to vector<8x256xbf16>
    %241 = vector.shape_cast %238 : vector<8x256xbf16> to vector<1x8x256xbf16>
    tpu.vector_store %arg4[%c4, %c0_89, %c0_90], %241 {strides = array<i32>} : memref<8x8x256xbf16, #tpu.memory_space<vmem>>, vector<1x8x256xbf16>,
    %242 = arith.extui %235 : vector<8x256xi1> to vector<8x256xi32>
    %243 = arith.sitofp %242 : vector<8x256xi32> to vector<8x256xf32>
    %244 = vector.shape_cast %243 : vector<8x256xf32> to vector<1x8x256xf32>
    %cst_91 = arith.constant dense<0.000000e+00> : vector<1xf32>
    %245 = vector.multi_reduction <add>, %244, %cst_91 [1, 2] : vector<1x8x256xf32> to vector<1xf32>
    %246 = vector.shape_cast %245 : vector<1xf32> to vector<1x1x1xf32>
    %247 = vector.extract %246[0, 0, 0] : f32 from vector<1x1x1xf32>
    %248 = arith.addf %202, %247 : f32
    %c8_i32_92 = arith.constant 8 : i32
    %249 = arith.muli %arg1, %c8_i32_92 : i32
    %c5_i32 = arith.constant 5 : i32
    %250 = arith.addi %249, %c5_i32 : i32
    %c-1028477387_i32_93 = arith.constant -1028477387 : i32
    %251 = arith.muli %0, %c-1028477387_i32_93 : i32
    %c-1640531527_i32_94 = arith.constant -1640531527 : i32
    %252 = arith.muli %250, %c-1640531527_i32_94 : i32
    %253 = arith.addi %251, %252 : i32
    %c16_i32_95 = arith.constant 16 : i32
    %254 = arith.shrui %253, %c16_i32_95 : i32
    %255 = arith.xori %253, %254 : i32
    %c-2048144789_i32_96 = arith.constant -2048144789 : i32
    %256 = arith.muli %255, %c-2048144789_i32_96 : i32
    %c13_i32_97 = arith.constant 13 : i32
    %257 = arith.shrui %256, %c13_i32_97 : i32
    %258 = arith.xori %256, %257 : i32
    %c-1028477387_i32_98 = arith.constant -1028477387 : i32
    %259 = arith.muli %258, %c-1028477387_i32_98 : i32
    %c16_i32_99 = arith.constant 16 : i32
    %260 = arith.shrui %259, %c16_i32_99 : i32
    %261 = arith.xori %259, %260 : i32
    %c-1640531527_i32_100 = arith.constant -1640531527 : i32
    %262 = vector.broadcast %c-1640531527_i32_100 : i32 to vector<8x256xi32>
    %263 = arith.muli %18, %262 : vector<8x256xi32>
    %264 = vector.broadcast %261 : i32 to vector<8x256xi32>
    %265 = arith.addi %263, %264 : vector<8x256xi32>
    %c16_i32_101 = arith.constant 16 : i32
    %266 = vector.broadcast %c16_i32_101 : i32 to vector<8x256xi32>
    %267 = arith.shrui %265, %266 : vector<8x256xi32>
    %268 = arith.xori %265, %267 : vector<8x256xi32>
    %c-2048144789_i32_102 = arith.constant -2048144789 : i32
    %269 = vector.broadcast %c-2048144789_i32_102 : i32 to vector<8x256xi32>
    %270 = arith.muli %268, %269 : vector<8x256xi32>
    %c13_i32_103 = arith.constant 13 : i32
    %271 = vector.broadcast %c13_i32_103 : i32 to vector<8x256xi32>
    %272 = arith.shrui %270, %271 : vector<8x256xi32>
    %273 = arith.xori %270, %272 : vector<8x256xi32>
    %c-1028477387_i32_104 = arith.constant -1028477387 : i32
    %274 = vector.broadcast %c-1028477387_i32_104 : i32 to vector<8x256xi32>
    %275 = arith.muli %273, %274 : vector<8x256xi32>
    %c16_i32_105 = arith.constant 16 : i32
    %276 = vector.broadcast %c16_i32_105 : i32 to vector<8x256xi32>
    %277 = arith.shrui %275, %276 : vector<8x256xi32>
    %278 = arith.xori %275, %277 : vector<8x256xi32>
    %c8_i32_106 = arith.constant 8 : i32
    %279 = vector.broadcast %c8_i32_106 : i32 to vector<8x256xi32>
    %280 = arith.shrui %278, %279 : vector<8x256xi32>
    %281 = arith.cmpi slt, %280, %10 : vector<8x256xi32>
    %282 = arith.extui %281 : vector<8x256xi1> to vector<8x256xi32>
    %283 = arith.sitofp %282 : vector<8x256xi32> to vector<8x256xf32>
    %284 = arith.truncf %283 : vector<8x256xf32> to vector<8x256xbf16>
    %c5 = arith.constant 5 : index
    %c0_107 = arith.constant 0 : index
    %c0_108 = arith.constant 0 : index
    %285 = vector.load %arg4[%c5, %c0_107, %c0_108] : memref<8x8x256xbf16, #tpu.memory_space<vmem>>, vector<1x8x256xbf16>
    %286 = vector.shape_cast %285 : vector<1x8x256xbf16> to vector<8x256xbf16>
    %287 = vector.shape_cast %284 : vector<8x256xbf16> to vector<1x8x256xbf16>
    tpu.vector_store %arg4[%c5, %c0_107, %c0_108], %287 {strides = array<i32>} : memref<8x8x256xbf16, #tpu.memory_space<vmem>>, vector<1x8x256xbf16>,
    %288 = arith.extui %281 : vector<8x256xi1> to vector<8x256xi32>
    %289 = arith.sitofp %288 : vector<8x256xi32> to vector<8x256xf32>
    %290 = vector.shape_cast %289 : vector<8x256xf32> to vector<1x8x256xf32>
    %cst_109 = arith.constant dense<0.000000e+00> : vector<1xf32>
    %291 = vector.multi_reduction <add>, %290, %cst_109 [1, 2] : vector<1x8x256xf32> to vector<1xf32>
    %292 = vector.shape_cast %291 : vector<1xf32> to vector<1x1x1xf32>
    %293 = vector.extract %292[0, 0, 0] : f32 from vector<1x1x1xf32>
    %294 = arith.addf %248, %293 : f32
    %c8_i32_110 = arith.constant 8 : i32
    %295 = arith.muli %arg1, %c8_i32_110 : i32
    %c6_i32 = arith.constant 6 : i32
    %296 = arith.addi %295, %c6_i32 : i32
    %c-1028477387_i32_111 = arith.constant -1028477387 : i32
    %297 = arith.muli %0, %c-1028477387_i32_111 : i32
    %c-1640531527_i32_112 = arith.constant -1640531527 : i32
    %298 = arith.muli %296, %c-1640531527_i32_112 : i32
    %299 = arith.addi %297, %298 : i32
    %c16_i32_113 = arith.constant 16 : i32
    %300 = arith.shrui %299, %c16_i32_113 : i32
    %301 = arith.xori %299, %300 : i32
    %c-2048144789_i32_114 = arith.constant -2048144789 : i32
    %302 = arith.muli %301, %c-2048144789_i32_114 : i32
    %c13_i32_115 = arith.constant 13 : i32
    %303 = arith.shrui %302, %c13_i32_115 : i32
    %304 = arith.xori %302, %303 : i32
    %c-1028477387_i32_116 = arith.constant -1028477387 : i32
    %305 = arith.muli %304, %c-1028477387_i32_116 : i32
    %c16_i32_117 = arith.constant 16 : i32
    %306 = arith.shrui %305, %c16_i32_117 : i32
    %307 = arith.xori %305, %306 : i32
    %c-1640531527_i32_118 = arith.constant -1640531527 : i32
    %308 = vector.broadcast %c-1640531527_i32_118 : i32 to vector<8x256xi32>
    %309 = arith.muli %18, %308 : vector<8x256xi32>
    %310 = vector.broadcast %307 : i32 to vector<8x256xi32>
    %311 = arith.addi %309, %310 : vector<8x256xi32>
    %c16_i32_119 = arith.constant 16 : i32
    %312 = vector.broadcast %c16_i32_119 : i32 to vector<8x256xi32>
    %313 = arith.shrui %311, %312 : vector<8x256xi32>
    %314 = arith.xori %311, %313 : vector<8x256xi32>
    %c-2048144789_i32_120 = arith.constant -2048144789 : i32
    %315 = vector.broadcast %c-2048144789_i32_120 : i32 to vector<8x256xi32>
    %316 = arith.muli %314, %315 : vector<8x256xi32>
    %c13_i32_121 = arith.constant 13 : i32
    %317 = vector.broadcast %c13_i32_121 : i32 to vector<8x256xi32>
    %318 = arith.shrui %316, %317 : vector<8x256xi32>
    %319 = arith.xori %316, %318 : vector<8x256xi32>
    %c-1028477387_i32_122 = arith.constant -1028477387 : i32
    %320 = vector.broadcast %c-1028477387_i32_122 : i32 to vector<8x256xi32>
    %321 = arith.muli %319, %320 : vector<8x256xi32>
    %c16_i32_123 = arith.constant 16 : i32
    %322 = vector.broadcast %c16_i32_123 : i32 to vector<8x256xi32>
    %323 = arith.shrui %321, %322 : vector<8x256xi32>
    %324 = arith.xori %321, %323 : vector<8x256xi32>
    %c8_i32_124 = arith.constant 8 : i32
    %325 = vector.broadcast %c8_i32_124 : i32 to vector<8x256xi32>
    %326 = arith.shrui %324, %325 : vector<8x256xi32>
    %327 = arith.cmpi slt, %326, %10 : vector<8x256xi32>
    %328 = arith.extui %327 : vector<8x256xi1> to vector<8x256xi32>
    %329 = arith.sitofp %328 : vector<8x256xi32> to vector<8x256xf32>
    %330 = arith.truncf %329 : vector<8x256xf32> to vector<8x256xbf16>
    %c6 = arith.constant 6 : index
    %c0_125 = arith.constant 0 : index
    %c0_126 = arith.constant 0 : index
    %331 = vector.load %arg4[%c6, %c0_125, %c0_126] : memref<8x8x256xbf16, #tpu.memory_space<vmem>>, vector<1x8x256xbf16>
    %332 = vector.shape_cast %331 : vector<1x8x256xbf16> to vector<8x256xbf16>
    %333 = vector.shape_cast %330 : vector<8x256xbf16> to vector<1x8x256xbf16>
    tpu.vector_store %arg4[%c6, %c0_125, %c0_126], %333 {strides = array<i32>} : memref<8x8x256xbf16, #tpu.memory_space<vmem>>, vector<1x8x256xbf16>,
    %334 = arith.extui %327 : vector<8x256xi1> to vector<8x256xi32>
    %335 = arith.sitofp %334 : vector<8x256xi32> to vector<8x256xf32>
    %336 = vector.shape_cast %335 : vector<8x256xf32> to vector<1x8x256xf32>
    %cst_127 = arith.constant dense<0.000000e+00> : vector<1xf32>
    %337 = vector.multi_reduction <add>, %336, %cst_127 [1, 2] : vector<1x8x256xf32> to vector<1xf32>
    %338 = vector.shape_cast %337 : vector<1xf32> to vector<1x1x1xf32>
    %339 = vector.extract %338[0, 0, 0] : f32 from vector<1x1x1xf32>
    %340 = arith.addf %294, %339 : f32
    %c8_i32_128 = arith.constant 8 : i32
    %341 = arith.muli %arg1, %c8_i32_128 : i32
    %c7_i32 = arith.constant 7 : i32
    %342 = arith.addi %341, %c7_i32 : i32
    %c-1028477387_i32_129 = arith.constant -1028477387 : i32
    %343 = arith.muli %0, %c-1028477387_i32_129 : i32
    %c-1640531527_i32_130 = arith.constant -1640531527 : i32
    %344 = arith.muli %342, %c-1640531527_i32_130 : i32
    %345 = arith.addi %343, %344 : i32
    %c16_i32_131 = arith.constant 16 : i32
    %346 = arith.shrui %345, %c16_i32_131 : i32
    %347 = arith.xori %345, %346 : i32
    %c-2048144789_i32_132 = arith.constant -2048144789 : i32
    %348 = arith.muli %347, %c-2048144789_i32_132 : i32
    %c13_i32_133 = arith.constant 13 : i32
    %349 = arith.shrui %348, %c13_i32_133 : i32
    %350 = arith.xori %348, %349 : i32
    %c-1028477387_i32_134 = arith.constant -1028477387 : i32
    %351 = arith.muli %350, %c-1028477387_i32_134 : i32
    %c16_i32_135 = arith.constant 16 : i32
    %352 = arith.shrui %351, %c16_i32_135 : i32
    %353 = arith.xori %351, %352 : i32
    %c-1640531527_i32_136 = arith.constant -1640531527 : i32
    %354 = vector.broadcast %c-1640531527_i32_136 : i32 to vector<8x256xi32>
    %355 = arith.muli %18, %354 : vector<8x256xi32>
    %356 = vector.broadcast %353 : i32 to vector<8x256xi32>
    %357 = arith.addi %355, %356 : vector<8x256xi32>
    %c16_i32_137 = arith.constant 16 : i32
    %358 = vector.broadcast %c16_i32_137 : i32 to vector<8x256xi32>
    %359 = arith.shrui %357, %358 : vector<8x256xi32>
    %360 = arith.xori %357, %359 : vector<8x256xi32>
    %c-2048144789_i32_138 = arith.constant -2048144789 : i32
    %361 = vector.broadcast %c-2048144789_i32_138 : i32 to vector<8x256xi32>
    %362 = arith.muli %360, %361 : vector<8x256xi32>
    %c13_i32_139 = arith.constant 13 : i32
    %363 = vector.broadcast %c13_i32_139 : i32 to vector<8x256xi32>
    %364 = arith.shrui %362, %363 : vector<8x256xi32>
    %365 = arith.xori %362, %364 : vector<8x256xi32>
    %c-1028477387_i32_140 = arith.constant -1028477387 : i32
    %366 = vector.broadcast %c-1028477387_i32_140 : i32 to vector<8x256xi32>
    %367 = arith.muli %365, %366 : vector<8x256xi32>
    %c16_i32_141 = arith.constant 16 : i32
    %368 = vector.broadcast %c16_i32_141 : i32 to vector<8x256xi32>
    %369 = arith.shrui %367, %368 : vector<8x256xi32>
    %370 = arith.xori %367, %369 : vector<8x256xi32>
    %c8_i32_142 = arith.constant 8 : i32
    %371 = vector.broadcast %c8_i32_142 : i32 to vector<8x256xi32>
    %372 = arith.shrui %370, %371 : vector<8x256xi32>
    %373 = arith.cmpi slt, %372, %10 : vector<8x256xi32>
    %374 = arith.extui %373 : vector<8x256xi1> to vector<8x256xi32>
    %375 = arith.sitofp %374 : vector<8x256xi32> to vector<8x256xf32>
    %376 = arith.truncf %375 : vector<8x256xf32> to vector<8x256xbf16>
    %c7 = arith.constant 7 : index
    %c0_143 = arith.constant 0 : index
    %c0_144 = arith.constant 0 : index
    %377 = vector.load %arg4[%c7, %c0_143, %c0_144] : memref<8x8x256xbf16, #tpu.memory_space<vmem>>, vector<1x8x256xbf16>
    %378 = vector.shape_cast %377 : vector<1x8x256xbf16> to vector<8x256xbf16>
    %379 = vector.shape_cast %376 : vector<8x256xbf16> to vector<1x8x256xbf16>
    tpu.vector_store %arg4[%c7, %c0_143, %c0_144], %379 {strides = array<i32>} : memref<8x8x256xbf16, #tpu.memory_space<vmem>>, vector<1x8x256xbf16>,
    %380 = arith.extui %373 : vector<8x256xi1> to vector<8x256xi32>
    %381 = arith.sitofp %380 : vector<8x256xi32> to vector<8x256xf32>
    %382 = vector.shape_cast %381 : vector<8x256xf32> to vector<1x8x256xf32>
    %cst_145 = arith.constant dense<0.000000e+00> : vector<1xf32>
    %383 = vector.multi_reduction <add>, %382, %cst_145 [1, 2] : vector<1x8x256xf32> to vector<1xf32>
    %384 = vector.shape_cast %383 : vector<1xf32> to vector<1x1x1xf32>
    %385 = vector.extract %384[0, 0, 0] : f32 from vector<1x1x1xf32>
    %386 = arith.addf %340, %385 : f32
    %387 = vector.broadcast %386 : f32 to vector<1x1x1x1xf32>
    %c0_146 = arith.constant 0 : index
    %c0_147 = arith.constant 0 : index
    %c0_148 = arith.constant 0 : index
    %c0_149 = arith.constant 0 : index
    %388 = vector.load %arg5[%c0_146, %c0_147, %c0_148, %c0_149] : memref<1x1x1x1xf32, #tpu.memory_space<vmem>>, vector<1x1x1x1xf32>
    tpu.vector_store %arg5[%c0_146, %c0_147, %c0_148, %c0_149], %387 {strides = array<i32>} : memref<1x1x1x1xf32, #tpu.memory_space<vmem>>, vector<1x1x1x1xf32>,
    return
  }
  func.func @transform_0(%arg0: i32, %arg1: i32, %arg2: memref<1xi32, #tpu.memory_space<smem>>) -> (i32, i32) {
    %c0_i32 = arith.constant 0 : i32
    %c0_i32_0 = arith.constant 0 : i32
    return %arg0, %c0_i32 : i32, i32
  }
  func.func @transform_1(%arg0: i32, %arg1: i32, %arg2: memref<1xi32, #tpu.memory_space<smem>>) -> (i32, i32, i32) {
    %c0_i32 = arith.constant 0 : i32
    %c0_i32_0 = arith.constant 0 : i32
    return %arg1, %arg0, %c0_i32 : i32, i32, i32
  }
  func.func @transform_2(%arg0: i32, %arg1: i32, %arg2: memref<1xi32, #tpu.memory_space<smem>>) -> (i32, i32, i32, i32) {
    %c0_i32 = arith.constant 0 : i32
    %c0_i32_0 = arith.constant 0 : i32
    %c0_i32_1 = arith.constant 0 : i32
    return %arg0, %arg1, %c0_i32, %c0_i32_0 : i32, i32, i32, i32
  }
}

</mosaic_0001>

<bundles_post_ra>
// kernel: tpu_custom_call.1
= control target key start
LH: loop header
LB: loop body
LE: loop exit
PB: predicated region body
PF: predicated region fallthrough
CT: control target
= control target key end

     0   :  { %10 = vsyncpa [#allocation5], 0  ;;  %s781_s0 = inlined_call_operand.<no memory space> [shape: s32[1], index: 0, kind: input, shape index: {}]   ;;  %s782_s1 = inlined_call_operand.hbm [shape: f32[8,256], index: 1, kind: input, shape index: {}]   ;;  %s783_s2 = inlined_call_operand.hbm [shape: bf16[8,8,256], index: 2, kind: output, shape index: {0}]   ;;  %s784_s3 = inlined_call_operand.hbm [shape: f32[1,1,1,1], index: 3, kind: output, shape index: {1}]  }
   0x1   :  { %11 = vsyncpa [#allocation6], 0 }
   0x2   :  { %12 = vsyncpa [#allocation9], 0  ;;  %s18_s14 = sshll.u32 %s782_s1, 4  ;;  %s634_s15 = smov [#allocation4]   ;;  %s19_s14 = int_to_ptr.hbm [resolvable:$true] %s18_s14 }
   0x3   :  { %s20_s16 = sshll.u32 %s634_s15, 4  ;;  %s21_s16 = int_to_ptr.vmem [resolvable:$true] %s20_s16 }
   0x4   :  { %23 = dma.hbm_to_vmem [thread:$0]  %s19_s14, 256, %s21_s16, [#allocation5]  }
   0x5   :  { %628 = dma.done.wait [#allocation5], 256  }
   0x6   :  { %629 = vsyncadd [#allocation5], 4294967040  ;;  %v41_v0 = vlaneseq  ;;  %s666_s19 = smul.u32 3266489909, %s781_s0  ;;  %v29_v7 = vld [vmem:[#allocation4] sm:$0xff]  ;;  %v30_v8 = vld [vmem:[#allocation4 + $0x8] sm:$0xff] }
   0x7   :  { %v31_v9 = vmul.f32 0.003921569, %v29_v7  ;;  %v32_v10 = vmul.f32 0.003921569, %v30_v8 }
   0x8   :  { %v42_v1 = vshrl.u32 %v41_v0, 7  ;;  %v44_v2 = vand.u32 127, %v41_v0  ;;  %s55_s1 = sshrl.u32 %s666_s19, 16  ;;  %s160_s20 = sadd.s32 1013904242, %s666_s19 }
   0x9   :  { %s56_s21 = sxor.u32 %s55_s1, %s666_s19  ;;  %s161_s22 = sshrl.u32 %s160_s20, 16  ;;  %v33_v13 = vmax.f32 %v31_v9, 0.0  ;;  %v34_v14 = vmax.f32 %v32_v10, 0.0 }
   0xa   :  { %v45_v3 = vadd.s32 128, %v44_v2  ;;  %v49_v4 = vmul.u32 256, %v42_v1  ;;  %s57_s23 = smul.u32 2246822507, %s56_s21  ;;  %s162_s24 = sxor.u32 %s161_s22, %s160_s20 }
   0xb   :  { %s163_s25 = smul.u32 2246822507, %s162_s24  ;;  %s264_s26 = sadd.s32 2027808484, %s666_s19  ;;  %v35_v15 = vmin.f32 %v33_v13, 1.0  ;;  %v36_v16 = vmin.f32 %v34_v14, 1.0 }
   0xc   :  { %v50_v5 = vadd.s32 %v49_v4, %v44_v2  ;;  %v51_v6 = vadd.s32 %v49_v4, %v45_v3  ;;  %s58_s0 = sshrl.u32 %s57_s23, 13  ;;  %s265_s27 = sshrl.u32 %s264_s26, 16 }
   0xd   :  { %s59_s28 = sxor.u32 %s58_s0, %s57_s23  ;;  %s164_s29 = sshrl.u32 %s163_s25, 13  ;;  %v37_v21 = vmul.f32 16777216.0, %v35_v15  ;;  %v38_v22 = vmul.f32 16777216.0, %v36_v16 }
   0xe   :  { %s60_s30 = smul.u32 3266489909, %s59_s28  ;;  %s165_s4 = sxor.u32 %s164_s29, %s163_s25  ;;  %v672_v11 = vmul.u32 2654435769, %v50_v5  ;;  %v674_v12 = vmul.u32 2654435769, %v51_v6 }
   0xf   :  { %s166_s5 = smul.u32 3266489909, %s165_s4  ;;  %s266_s6 = sxor.u32 %s265_s27, %s264_s26  ;;  %vm524_vm0 = vcmp.lt.s32.totalorder %v37_v21, 0  ;;  %v525_v27 = vceil.f32 %v37_v21  ;;  %v526_v28 = vfloor.f32 %v37_v21  ;;  %vm529_vm1 = vcmp.lt.s32.totalorder %v38_v22, 0 }
  0x10   :  { %s61_s7 = sshrl.u32 %s60_s30, 16  ;;  %s267_s8 = smul.u32 2246822507, %s266_s6  ;;  %v530_v29 = vceil.f32 %v38_v22  ;;  %v531_v30 = vfloor.f32 %v38_v22 }
  0x11   :  { %s62_s9 = sxor.u32 %s61_s7, %s60_s30  ;;  %s167_s10 = sshrl.u32 %s166_s5, 16  ;;  %v527_v36 = vsel %vm524_vm0, %v525_v27, %v526_v28 }
  0x12   :  { %v65_v17 = vstv %s62_s9  ;;  %s168_s11 = sxor.u32 %s167_s10, %s166_s5  ;;  %s268_s12 = sshrl.u32 %s267_s8, 13  ;;  %v532_v39 = vsel %vm529_vm1, %v530_v29, %v531_v30  ;;  %v687_v46 = vcvt.f32.s32 %v527_v36  ;;  %v635_v30 = vmov 0.0  }
  0x13   :  { %v66_v18 = vadd.s32 %v65_v17, %v672_v11  ;;  %v67_v19 = vadd.s32 %v65_v17, %v674_v12  ;;  %v169_v20 = vstv %s168_s11  ;;  %s269_s13 = sxor.u32 %s268_s12, %s267_s8  ;;  %s108_s14 = sadd.s32 2654435769, %s666_s19  ;;  %v691_v50 = vcvt.f32.s32 %v532_v39 }
  0x14   :  { %v170_v23 = vadd.s32 %v169_v20, %v672_v11  ;;  %v171_v24 = vadd.s32 %v169_v20, %v674_v12  ;;  %s270_s15 = smul.u32 3266489909, %s269_s13  ;;  %s109_s16 = sshrl.u32 %s108_s14, 16 }
  0x15   :  { %v68_v25 = vshrl.u32 %v66_v18, 16  ;;  %v69_v26 = vshrl.u32 %v67_v19, 16  ;;  %s110_s17 = sxor.u32 %s109_s16, %s108_s14  ;;  %s212_s18 = sadd.s32 3668340011, %s666_s19 }
  0x16   :  { %s271_s1 = sshrl.u32 %s270_s15, 16  ;;  %s111_s20 = smul.u32 2246822507, %s110_s17  ;;  %v172_v33 = vshrl.u32 %v170_v23, 16  ;;  %v173_v34 = vshrl.u32 %v171_v24, 16 }
  0x17   :  { %v70_v31 = vxor.u32 %v68_v25, %v66_v18  ;;  %v71_v32 = vxor.u32 %v69_v26, %v67_v19  ;;  %s272_s21 = sxor.u32 %s271_s1, %s270_s15  ;;  %s213_s22 = sshrl.u32 %s212_s18, 16 }
  0x18   :  { %v273_v35 = vstv %s272_s21  ;;  %s112_s23 = sshrl.u32 %s111_s20, 13  ;;  %s214_s24 = sxor.u32 %s213_s22, %s212_s18  ;;  %v174_v40 = vxor.u32 %v172_v33, %v170_v23  ;;  %v175_v41 = vxor.u32 %v173_v34, %v171_v24 }
  0x19   :  { %v72_v37 = vmul.u32 2246822507, %v70_v31  ;;  %v73_v38 = vmul.u32 2246822507, %v71_v32  ;;  %s113_s25 = sxor.u32 %s112_s23, %s111_s20  ;;  %s215_s26 = smul.u32 2246822507, %s214_s24  ;;  %v274_v42 = vadd.s32 %v273_v35, %v672_v11  ;;  %v275_v45 = vadd.s32 %v273_v35, %v674_v12 }
  0x1a   :  { %s114_s0 = smul.u32 3266489909, %s113_s25  ;;  %s316_s27 = sadd.s32 387276957, %s666_s19  ;;  %v176_v47 = vmul.u32 2246822507, %v174_v40 }
  0x1b   :  { %v74_v43 = vshrl.u32 %v72_v37, 13  ;;  %v75_v44 = vshrl.u32 %v73_v38, 13  ;;  %s216_s28 = sshrl.u32 %s215_s26, 13  ;;  %s317_s29 = sshrl.u32 %s316_s27, 16  ;;  %v177_v48 = vmul.u32 2246822507, %v175_v41 }
  0x1c   :  { %v276_v49 = vshrl.u32 %v274_v42, 16  ;;  %s115_s30 = sshrl.u32 %s114_s0, 16  ;;  %s689_s4 = sxor.u32 %s216_s28, %s215_s26  ;;  %v277_v53 = vshrl.u32 %v275_v45, 16  ;;  %v178_v54 = vshrl.u32 %v176_v47, 13 }
  0x1d   :  { %v76_v51 = vxor.u32 %v74_v43, %v72_v37  ;;  %v77_v52 = vxor.u32 %v75_v44, %v73_v38  ;;  %s116_s5 = sxor.u32 %s115_s30, %s114_s0  ;;  %s218_s6 = smul.u32 3266489909, %s689_s4  ;;  %v179_v55 = vshrl.u32 %v177_v48, 13 }
  0x1e   :  { %v278_v56 = vxor.u32 %v276_v49, %v274_v42  ;;  %v117_v57 = vstv %s116_s5  ;;  %s694_s7 = sxor.u32 %s317_s29, %s316_s27  ;;  %s368_s8 = sadd.s32 3041712726, %s666_s19  ;;  %v279_v60 = vxor.u32 %v277_v53, %v275_v45  ;;  %v180_v62 = vxor.u32 %v178_v54, %v176_v47 }
  0x1f   :  { %v78_v58 = vmul.u32 3266489909, %v76_v51  ;;  %v79_v59 = vmul.u32 3266489909, %v77_v52  ;;  %v118_v61 = vadd.s32 %v117_v57, %v672_v11  ;;  %s369_s9 = sshrl.u32 %s368_s8, 16  ;;  %v181_v63 = vxor.u32 %v179_v55, %v177_v48  ;;  %s702_s11 = sshrl.u32 %s218_s6, 16 }
  0x20   :  { %v280_v0 = vmul.u32 2246822507, %v278_v56  ;;  %v119_v1 = vadd.s32 %v117_v57, %v674_v12  ;;  %s319_s10 = smul.u32 2246822507, %s694_s7  ;;  %v281_v4 = vmul.u32 2246822507, %v279_v60  ;;  %s704_s12 = sxor.u32 %s369_s9, %s368_s8 }
  0x21   :  { %v80_v2 = vshrl.u32 %v78_v58, 16  ;;  %v81_v3 = vshrl.u32 %v79_v59, 16  ;;  %v120_v5 = vshrl.u32 %v118_v61, 16  ;;  %v182_v6 = vmul.u32 3266489909, %v180_v62  ;;  %s724_s22 = sxor.u32 %s702_s11, %s218_s6  ;;  %s479_s7 = sshll.u32 %s783_s2, 4  ;;  %s480_s7 = int_to_ptr.hbm [resolvable:$true] %s479_s7 }
  0x22   :  { %v183_v7 = vmul.u32 3266489909, %v181_v63  ;;  %v282_v8 = vshrl.u32 %v280_v0, 13  ;;  %v121_v9 = vshrl.u32 %v119_v1, 16  ;;  %v283_v14 = vshrl.u32 %v281_v4, 13  ;;  %s320_s13 = sshrl.u32 %s319_s10, 13 }
  0x23   :  { %v82_v10 = vxor.u32 %v80_v2, %v78_v58  ;;  %v83_v13 = vxor.u32 %v81_v3, %v79_v59  ;;  %v122_v15 = vxor.u32 %v120_v5, %v118_v61  ;;  %s371_s14 = smul.u32 2246822507, %s704_s12  ;;  %v184_v16 = vshrl.u32 %v182_v6, 16  ;;  %s707_s15 = sxor.u32 %s320_s13, %s319_s10 }
  0x24   :  { %v185_v17 = vshrl.u32 %v183_v7, 16  ;;  %v284_v18 = vxor.u32 %v282_v8, %v280_v0  ;;  %v123_v19 = vxor.u32 %v121_v9, %v119_v1  ;;  %s420_s16 = sadd.s32 1401181199, %s666_s19  ;;  %v285_v22 = vxor.u32 %v283_v14, %v281_v4  ;;  %s322_s17 = smul.u32 3266489909, %s707_s15 }
  0x25   :  { %v84_v20 = vshrl.u32 %v82_v10, 8  ;;  %v85_v21 = vshrl.u32 %v83_v13, 8  ;;  %v124_v23 = vmul.u32 2246822507, %v122_v15  ;;  %v186_v24 = vxor.u32 %v184_v16, %v182_v6  ;;  %s372_s18 = sshrl.u32 %s371_s14, 13  ;;  %s421_s1 = sshrl.u32 %s420_s16, 16 }
  0x26   :  { %v187_v25 = vxor.u32 %v185_v17, %v183_v7  ;;  %v286_v26 = vmul.u32 3266489909, %v284_v18  ;;  %v125_v27 = vmul.u32 2246822507, %v123_v19  ;;  %v287_v28 = vmul.u32 3266489909, %v285_v22  ;;  %s717_s21 = sxor.u32 %s372_s18, %s371_s14  ;;  %s422_s24 = sxor.u32 %s421_s1, %s420_s16 }
  0x27   :  { %vm86_vm2 = vcmp.lt.s32.totalorder %v84_v20, %v687_v46  ;;  %vm87_vm3 = vcmp.lt.s32.totalorder %v85_v21, %v691_v50  ;;  %v126_v29 = vshrl.u32 %v124_v23, 13  ;;  %s323_s20 = sshrl.u32 %s322_s17, 16  ;;  %v188_v33 = vshrl.u32 %v186_v24, 8  ;;  %s374_s23 = smul.u32 3266489909, %s717_s21 }
  0x28   :  { %v508_v31 = vsel %vm86_vm2, 1.0, %v635_v30  ;;  %v509_v32 = vsel %vm87_vm3, 1.0, %v635_v30  ;;  %v189_v34 = vshrl.u32 %v187_v25, 8  ;;  %v288_v37 = vshrl.u32 %v286_v26, 16  ;;  %s324_s25 = sxor.u32 %s323_s20, %s322_s17  ;;  %s423_s26 = smul.u32 2246822507, %s422_s24 }
  0x29   :  { %v94_v35 = vadd.f32 %v509_v32, %v508_v31  ;;  %v92_v36 = vpack.c.bf16 %v509_v32, %v508_v31  ;;  %v289_v38 = vshrl.u32 %v287_v28, 16  ;;  %vm190_vm4 = vcmp.lt.s32.totalorder %v188_v33, %v687_v46  ;;  %s375_s0 = sshrl.u32 %s374_s23, 16  ;;  %s636_s8 = smov [#allocation7]  }
  0x2a   :  { %vm191_vm5 = vcmp.lt.s32.totalorder %v189_v34, %v691_v50  ;;  %v127_v39 = vshrl.u32 %v125_v27, 13  ;;  %v128_v40 = vxor.u32 %v126_v29, %v124_v23  ;;  %v512_v41 = vsel %vm190_vm4, 1.0, %v635_v30  ;;  %s424_s19 = sshrl.u32 %s423_s26, 13  ;;  %s376_s29 = sxor.u32 %s375_s0, %s374_s23 }
  0x2b   :  { %95 = vadd.xlane.f32.xlu0 %v94_v35  ;;  %93 = vst [vmem:[#allocation7] sm:$0xff] %v92_v36  ;;  %v513_v42 = vsel %vm191_vm5, 1.0, %v635_v30  ;;  %v290_v43 = vxor.u32 %v288_v37, %v286_v26  ;;  %v291_v44 = vxor.u32 %v289_v38, %v287_v28  ;;  %v221_v53 = vstv %s724_s22  ;;  %s425_s27 = sxor.u32 %s424_s19, %s423_s26  ;;  %s477_s9 = sshll.u32 %s636_s8, 4  ;;  %s478_s9 = int_to_ptr.vmem [resolvable:$true] %s477_s9 }
  0x2c   :  { %v199_v45 = vadd.f32 %v513_v42, %v512_v41  ;;  %v196_v47 = vpack.c.bf16 %v513_v42, %v512_v41  ;;  %v129_v48 = vxor.u32 %v127_v39, %v125_v27  ;;  %v130_v49 = vmul.u32 3266489909, %v128_v40  ;;  %s426_s28 = smul.u32 3266489909, %s425_s27  ;;  %s637_s10 = smov 128  }
  0x2d   :  { %v292_v51 = vshrl.u32 %v290_v43, 8  ;;  %v293_v52 = vshrl.u32 %v291_v44, 8  ;;  %v325_v54 = vstv %s324_s25  ;;  %v222_v57 = vadd.s32 %v221_v53, %v672_v11  ;;  %s638_s11 = smov 8   ;;  %s639_s24 = smov [#allocation8]  }
  0x2e   :  { %200 = vadd.xlane.f32.xlu1 %v199_v45  ;;  %198 = vst [vmem:[#allocation7 + $0x10] sm:$0xff] %v196_v47  ;;  %v131_v55 = vmul.u32 3266489909, %v129_v48  ;;  %v132_v56 = vshrl.u32 %v130_v49, 16  ;;  %v223_v58 = vadd.s32 %v221_v53, %v674_v12  ;;  %v326_v59 = vadd.s32 %v325_v54, %v672_v11  ;;  %s427_s30 = sshrl.u32 %s426_s28, 16  ;;  %s491_s25 = sshll.u32 %s639_s24, 4  ;;  %s492_s25 = int_to_ptr.vmem [resolvable:$true] %s491_s25 }
  0x2f   :  { %vm294_vm6 = vcmp.lt.s32.totalorder %v292_v51, %v687_v46  ;;  %vm295_vm7 = vcmp.lt.s32.totalorder %v293_v52, %v691_v50  ;;  %v327_v60 = vadd.s32 %v325_v54, %v674_v12  ;;  %v224_v3 = vshrl.u32 %v222_v57, 16  ;;  %s748_s4 = sxor.u32 %s427_s30, %s426_s28  ;;  %s493_s0 = sshll.u32 %s784_s3, 4  ;;  %s494_s0 = int_to_ptr.hbm [resolvable:$true] %s493_s0 }
  0x30   :  { %v516_v61 = vsel %vm294_vm6, 1.0, %v635_v30  ;;  %v517_v62 = vsel %vm295_vm7, 1.0, %v635_v30  ;;  %v133_v63 = vshrl.u32 %v131_v55, 16  ;;  %v134_v0 = vxor.u32 %v132_v56, %v130_v49 }
  0x31   :  { %v303_v1 = vadd.f32 %v517_v62, %v516_v61  ;;  %v300_v2 = vpack.c.bf16 %v517_v62, %v516_v61  ;;  %v225_v4 = vshrl.u32 %v223_v58, 16  ;;  %v328_v7 = vshrl.u32 %v326_v59, 16 }
  0x32   :  { %v135_v5 = vxor.u32 %v133_v63, %v131_v55  ;;  %v136_v6 = vshrl.u32 %v134_v0, 8  ;;  %v329_v8 = vshrl.u32 %v327_v60, 16  ;;  %v226_v9 = vxor.u32 %v224_v3, %v222_v57 }
  0x33   :  { %304 = vadd.xlane.f32.xlu2 %v303_v1  ;;  %302 = vst [vmem:[#allocation7 + $0x20] sm:$0xff] %v300_v2  ;;  %v227_v10 = vxor.u32 %v225_v4, %v223_v58  ;;  %v377_v13 = vstv %s376_s29  ;;  %v429_v14 = vstv %s748_s4  ;;  %v330_v16 = vxor.u32 %v328_v7, %v326_v59 }
  0x34   :  { %v137_v15 = vshrl.u32 %v135_v5, 8  ;;  %vm138_vm8 = vcmp.lt.s32.totalorder %v136_v6, %v687_v46  ;;  %v331_v17 = vxor.u32 %v329_v8, %v327_v60  ;;  %v228_v19 = vmul.u32 2246822507, %v226_v9 }
  0x35   :  { %v510_v18 = vsel %vm138_vm8, 1.0, %v635_v30  ;;  %v229_v20 = vmul.u32 2246822507, %v227_v10  ;;  %v378_v21 = vadd.s32 %v377_v13, %v672_v11  ;;  %v332_v22 = vmul.u32 2246822507, %v330_v16 }
  0x36   :  { %vm139_vm9 = vcmp.lt.s32.totalorder %v137_v15, %v691_v50  ;;  %v333_v23 = vmul.u32 2246822507, %v331_v17  ;;  %v379_v24 = vadd.s32 %v377_v13, %v674_v12  ;;  %v230_v26 = vshrl.u32 %v228_v19, 13 }
  0x37   :  { %v511_v25 = vsel %vm139_vm9, 1.0, %v635_v30  ;;  %v231_v27 = vshrl.u32 %v229_v20, 13  ;;  %v380_v28 = vshrl.u32 %v378_v21, 16  ;;  %v334_v32 = vshrl.u32 %v332_v22, 13 }
  0x38   :  { %v144_v29 = vpack.c.bf16 %v511_v25, %v510_v18  ;;  %v147_v31 = vadd.f32 %v511_v25, %v510_v18  ;;  %v335_v33 = vshrl.u32 %v333_v23, 13  ;;  %v232_v34 = vxor.u32 %v230_v26, %v228_v19 }
  0x39   :  { %v233_v35 = vxor.u32 %v231_v27, %v229_v20  ;;  %v381_v36 = vshrl.u32 %v379_v24, 16  ;;  %v382_v37 = vxor.u32 %v380_v28, %v378_v21  ;;  %v336_v38 = vxor.u32 %v334_v32, %v332_v22 }
  0x3a   :  { %146 = vst [vmem:[#allocation7 + $0x8] sm:$0xff] %v144_v29  ;;  %148 = vadd.xlane.f32.xlu0 %v147_v31  ;;  %v337_v39 = vxor.u32 %v335_v33, %v333_v23  ;;  %v430_v40 = vadd.s32 %v429_v14, %v672_v11  ;;  %v234_v41 = vmul.u32 3266489909, %v232_v34  ;;  %v431_v48 = vadd.s32 %v429_v14, %v674_v12 }
  0x3b   :  { %v235_v42 = vmul.u32 3266489909, %v233_v35  ;;  %v383_v43 = vxor.u32 %v381_v36, %v379_v24  ;;  %v384_v44 = vmul.u32 2246822507, %v382_v37  ;;  %v338_v45 = vmul.u32 3266489909, %v336_v38 }
  0x3c   :  { %v339_v47 = vmul.u32 3266489909, %v337_v39  ;;  %v432_v49 = vshrl.u32 %v430_v40, 16  ;;  %v236_v51 = vshrl.u32 %v234_v41, 16  ;;  %v433_v57 = vshrl.u32 %v431_v48, 16 }
  0x3d   :  { %v237_v52 = vshrl.u32 %v235_v42, 16  ;;  %v385_v53 = vmul.u32 2246822507, %v383_v43  ;;  %v386_v54 = vshrl.u32 %v384_v44, 13  ;;  %v340_v55 = vshrl.u32 %v338_v45, 16 }
  0x3e   :  { %v341_v56 = vshrl.u32 %v339_v47, 16  ;;  %v434_v58 = vxor.u32 %v432_v49, %v430_v40  ;;  %v238_v59 = vxor.u32 %v236_v51, %v234_v41  ;;  %v435_v0 = vxor.u32 %v433_v57, %v431_v48 }
  0x3f   :  { %v239_v60 = vxor.u32 %v237_v52, %v235_v42  ;;  %v387_v11 = vshrl.u32 %v385_v53, 13  ;;  %v388_v61 = vxor.u32 %v386_v54, %v384_v44  ;;  %v342_v62 = vxor.u32 %v340_v55, %v338_v45 }
  0x40   :  { %v343_v63 = vxor.u32 %v341_v56, %v339_v47  ;;  %v436_v1 = vmul.u32 2246822507, %v434_v58  ;;  %v240_v2 = vshrl.u32 %v238_v59, 8  ;;  %v437_v7 = vmul.u32 2246822507, %v435_v0 }
  0x41   :  { %v241_v3 = vshrl.u32 %v239_v60, 8  ;;  %v389_v12 = vxor.u32 %v387_v11, %v385_v53  ;;  %v390_v4 = vmul.u32 3266489909, %v388_v61  ;;  %v344_v5 = vshrl.u32 %v342_v62, 8 }
  0x42   :  { %v345_v6 = vshrl.u32 %v343_v63, 8  ;;  %v438_v8 = vshrl.u32 %v436_v1, 13  ;;  %vm242_vm10 = vcmp.lt.s32.totalorder %v240_v2, %v687_v46  ;;  %v439_v23 = vshrl.u32 %v437_v7, 13 }
  0x43   :  { %vm243_vm11 = vcmp.lt.s32.totalorder %v241_v3, %v691_v50  ;;  %v391_v9 = vmul.u32 3266489909, %v389_v12  ;;  %v392_v10 = vshrl.u32 %v390_v4, 16  ;;  %v514_v13 = vsel %vm242_vm10, 1.0, %v635_v30 }
  0x44   :  { %v515_v14 = vsel %vm243_vm11, 1.0, %v635_v30  ;;  %vm346_vm12 = vcmp.lt.s32.totalorder %v344_v5, %v687_v46  ;;  %vm347_vm13 = vcmp.lt.s32.totalorder %v345_v6, %v691_v50  ;;  %v440_v24 = vxor.u32 %v438_v8, %v436_v1 }
  0x45   :  { %v248_v15 = vpack.c.bf16 %v515_v14, %v514_v13  ;;  %v251_v16 = vadd.f32 %v515_v14, %v514_v13  ;;  %v518_v17 = vsel %vm346_vm12, 1.0, %v635_v30  ;;  %v519_v18 = vsel %vm347_vm13, 1.0, %v635_v30 }
  0x46   :  { %v352_v19 = vpack.c.bf16 %v519_v18, %v518_v17  ;;  %v355_v20 = vadd.f32 %v519_v18, %v518_v17  ;;  %v393_v21 = vshrl.u32 %v391_v9, 16  ;;  %v394_v22 = vxor.u32 %v392_v10, %v390_v4 }
  0x47   :  { %250 = vst [vmem:[#allocation7 + $0x18] sm:$0xff] %v248_v15  ;;  %252 = vadd.xlane.f32.xlu1 %v251_v16  ;;  %v441_v27 = vxor.u32 %v439_v23, %v437_v7  ;;  %v442_v28 = vmul.u32 3266489909, %v440_v24  ;;  %vm471_vm2 = vcmask 0  }
  0x48   :  { %354 = vst [vmem:[#allocation7 + $0x28] sm:$0xff] %v352_v19  ;;  %356 = vadd.xlane.f32.xlu2 %v355_v20  ;;  %v395_v25 = vxor.u32 %v393_v21, %v391_v9  ;;  %v396_v26 = vshrl.u32 %v394_v22, 8 }
  0x49   :  { %v443_v32 = vmul.u32 3266489909, %v441_v27  ;;  %v444_v33 = vshrl.u32 %v442_v28, 16 }
  0x4a   :  { %v397_v29 = vshrl.u32 %v395_v25, 8  ;;  %vm398_vm14 = vcmp.lt.s32.totalorder %v396_v26, %v687_v46 }
  0x4b   :  { %v520_v31 = vsel %vm398_vm14, 1.0, %v635_v30  ;;  %v445_v35 = vshrl.u32 %v443_v32, 16  ;;  %v446_v36 = vxor.u32 %v444_v33, %v442_v28 }
  0x4c   :  { %vm399_vm15 = vcmp.lt.s32.totalorder %v397_v29, %v691_v50 }
  0x4d   :  { %v521_v34 = vsel %vm399_vm15, 1.0, %v635_v30  ;;  %v447_v39 = vxor.u32 %v445_v35, %v443_v32  ;;  %v448_v40 = vshrl.u32 %v446_v36, 8 }
  0x4e   :  { %v404_v37 = vpack.c.bf16 %v521_v34, %v520_v31  ;;  %v407_v38 = vadd.f32 %v521_v34, %v520_v31 }
  0x4f   :  { %v449_v41 = vshrl.u32 %v447_v39, 8  ;;  %vm450_vm0 = vcmp.lt.s32.totalorder %v448_v40, %v687_v46 }
  0x50   :  { %406 = vst [vmem:[#allocation7 + $0x30] sm:$0xff] %v404_v37  ;;  %408 = vadd.xlane.f32.xlu0 %v407_v38  ;;  %v522_v42 = vsel %vm450_vm0, 1.0, %v635_v30 }
  0x51   :  { %vm451_vm1 = vcmp.lt.s32.totalorder %v449_v41, %v691_v50 }
  0x52   :  { %v523_v43 = vsel %vm451_vm1, 1.0, %v635_v30 }
  0x53   :  { %v456_v44 = vpack.c.bf16 %v523_v43, %v522_v42  ;;  %v459_v45 = vadd.f32 %v523_v43, %v522_v42 }
  0x55   :  { %458 = vst [vmem:[#allocation7 + $0x38] sm:$0xff] %v456_v44  ;;  %460 = vadd.xlane.f32.xlu1 %v459_v45 }
  0x56   :  { %485 = dma.vmem_to_hbm [thread:$0]  %s478_s9, 1024, %s480_s7, [#allocation6], %s637_s10, %s637_s10, %s638_s11  }
  0x9e   :  { %v96_v46 = vpop.xlane.xlu0 %95 }
  0x9f   :  { %v97_v47 = vrot.slane %v96_v46, 4 }
  0xa1   :  { %v98_v50 = vadd.f32 %v97_v47, %v96_v46  ;;  %v201_v48 = vpop.xlane.xlu1 %200 }
  0xa2   :  { %v202_v49 = vrot.slane %v201_v48, 4 }
  0xa3   :  { %v99_v30 = vrot.slane %v98_v50, 2 }
  0xa4   :  { %v203_v53 = vadd.f32 %v202_v49, %v201_v48 }
  0xa5   :  { %v100_v51 = vadd.f32 %v99_v30, %v98_v50 }
  0xa6   :  { %v204_v55 = vrot.slane %v203_v53, 2  ;;  %v305_v58 = vpop.xlane.xlu2 %304 }
  0xa7   :  { %v101_v52 = vrot.slane %v100_v51, 1  ;;  %v306_v11 = vrot.slane %v305_v58, 4 }
  0xa8   :  { %v205_v60 = vadd.f32 %v204_v55, %v203_v53 }
  0xa9   :  { %v102_v54 = vadd.f32 %v101_v52, %v100_v51  ;;  %v307_v0 = vadd.f32 %v306_v11, %v305_v58 }
  0xaa   :  { %v206_v63 = vrot.slane %v205_v60, 1 }
  0xab   :  { %534 = vpush %v102_v54  ;;  %v308_v12 = vrot.slane %v307_v0, 2 }
  0xac   :  { %v207_v3 = vadd.f32 %v206_v63, %v205_v60 }
  0xad   :  { %v149_v56 = vpop.xlane.xlu0 %148  ;;  %v309_v10 = vadd.f32 %v308_v12, %v307_v0 }
  0xae   :  { %v150_v57 = vrot.slane %v149_v56, 4 }
  0xaf   :  { %v310_v17 = vrot.slane %v309_v10, 1 }
  0xb0   :  { %v151_v59 = vadd.f32 %v150_v57, %v149_v56 }
  0xb1   :  { %v311_v24 = vadd.f32 %v310_v17, %v309_v10 }
  0xb2   :  { %v152_v61 = vrot.slane %v151_v59, 2 }
  0xb4   :  { %v153_v62 = vadd.f32 %v152_v61, %v151_v59 }
  0xb6   :  { %v154_v1 = vrot.slane %v153_v62, 1 }
  0xb8   :  { %v155_v2 = vadd.f32 %v154_v1, %v153_v62 }
  0xba   :  { %v253_v4 = vpop.xlane.xlu1 %252  ;;  %536 = vpush %v155_v2 }
  0xbb   :  { %v254_v5 = vrot.slane %v253_v4, 4  ;;  %v357_v6 = vpop.xlane.xlu2 %356  ;;  %538 = vpush %v207_v3 }
  0xbc   :  { %v358_v7 = vrot.slane %v357_v6, 4 }
  0xbd   :  { %v255_v8 = vadd.f32 %v254_v5, %v253_v4 }
  0xbe   :  { %v359_v9 = vadd.f32 %v358_v7, %v357_v6 }
  0xbf   :  { %v256_v13 = vrot.slane %v255_v8, 2 }
  0xc0   :  { %v360_v14 = vrot.slane %v359_v9, 2 }
  0xc1   :  { %v257_v15 = vadd.f32 %v256_v13, %v255_v8 }
  0xc2   :  { %v361_v16 = vadd.f32 %v360_v14, %v359_v9 }
  0xc3   :  { %v409_v18 = vpop.xlane.xlu0 %408  ;;  %v258_v19 = vrot.slane %v257_v15, 1 }
  0xc4   :  { %v410_v20 = vrot.slane %v409_v18, 4  ;;  %v362_v21 = vrot.slane %v361_v16, 1 }
  0xc5   :  { %v259_v22 = vadd.f32 %v258_v19, %v257_v15 }
  0xc6   :  { %v411_v23 = vadd.f32 %v410_v20, %v409_v18  ;;  %v363_v25 = vadd.f32 %v362_v21, %v361_v16 }
  0xc7   :  { %540 = vpush %v259_v22 }
  0xc8   :  { %v412_v26 = vrot.slane %v411_v23, 2  ;;  %542 = vpush %v311_v24  ;;  %v461_v28 = vpop.xlane.xlu1 %460 }
  0xc9   :  { %544 = vpush %v363_v25  ;;  %v462_v29 = vrot.slane %v461_v28, 4 }
  0xca   :  { %v413_v27 = vadd.f32 %v412_v26, %v411_v23 }
  0xcb   :  { %v463_v32 = vadd.f32 %v462_v29, %v461_v28 }
  0xcc   :  { %v414_v31 = vrot.slane %v413_v27, 1 }
  0xcd   :  { %v464_v34 = vrot.slane %v463_v32, 2 }
  0xce   :  { %v415_v33 = vadd.f32 %v414_v31, %v413_v27 }
  0xcf   :  { %v465_v35 = vadd.f32 %v464_v34, %v463_v32 }
  0xd0   :  { %546 = vpush %v415_v33 }
  0xd1   :  { %v466_v36 = vrot.slane %v465_v35, 1 }
  0xd3   :  { %v467_v37 = vadd.f32 %v466_v36, %v465_v35 }
  0xd5   :  { %548 = vpush %v467_v37 }
  0xdc   :  { %s535_s2 = spop %534 }
  0xeb   :  { %s537_s12 = spop %536 }
  0xec   :  { %s157_s13 = sadd.f32 %s537_s12, %s535_s2  ;;  %s539_s14 = spop %538 }
  0xee   :  { %s209_s15 = sadd.f32 %s539_s14, %s157_s13 }
  0xf8   :  { %s541_s16 = spop %540 }
  0xf9   :  { %s261_s17 = sadd.f32 %s541_s16, %s209_s15  ;;  %s543_s18 = spop %542 }
  0xfa   :  { %s545_s20 = spop %544 }
  0xfb   :  { %s313_s1 = sadd.f32 %s543_s18, %s261_s17 }
  0xfd   :  { %s365_s21 = sadd.f32 %s545_s20, %s313_s1 }
 0x101   :  { %s547_s22 = spop %546 }
 0x102   :  { %s417_s23 = sadd.f32 %s547_s22, %s365_s21 }
 0x106   :  { %s549_s27 = spop %548 }
 0x107   :  { %s469_s28 = sadd.f32 %s549_s27, %s417_s23 }
 0x109   :  { %v470_v38 = vstv %s469_s28 }
 0x10a   :  { %472 = vst.msk [vmem:[#allocation8] sm:$0x1] %vm471_vm2, %v470_v38 }
 0x10b   :  { %496 = dma.vmem_to_hbm [thread:$0]  %s492_s25, 16, %s494_s0, [#allocation9]  }
 0x10c   :  { %630 = dma.done.wait [#allocation6], 1024  }
 0x10d   :  { %631 = vsyncadd [#allocation6], 4294966272 }
 0x10e   :  { %632 = dma.done.wait [#allocation9], 16  }
 0x10f   :  { %633 = vsyncadd [#allocation9], 4294967280 }
 0x110   :  { %505 = vsyncpa [#allocation5], 1 }
 0x111   :  { %506 = vsyncpa [#allocation6], 1 }
 0x112   :  { %507 = vsyncpa [#allocation9], 1 }

</bundles_post_ra>
